<compile_context>
chip_gen: v7x
topology: tpu7x:2x2x1
jax: 0.10.0
libtpu: 0.0.40
codegen_flags: <defaults>
</compile_context>

<pallas_src>
import functools

import jax
import jax.numpy as jnp
from jax import lax
from jax.experimental import pallas as pl
from jax.experimental.pallas import tpu as pltpu


# ----------------------------------------------------------------------------
# Hardware-roll probe: figure out pltpu.roll's convention once (cached).
# ----------------------------------------------------------------------------
@functools.cache
def _hw_roll_mode():
    """'jnp' if pltpu.roll matches jnp.roll, 'rev' if opposite, None -> fallback."""
    try:
        def probe(o_ref):
            x = lax.broadcasted_iota(jnp.float32, (8, 128), 1)
            o_ref[...] = pltpu.roll(x, shift=1, axis=1)

        out = pl.pallas_call(
            probe, out_shape=jax.ShapeDtypeStruct((8, 128), jnp.float32))()
        first = float(out[0, 0])
        if first == 127.0:
            return "jnp"
        if first == 1.0:
            return "rev"
        return None
    except Exception:  # any lowering / runtime issue -> safe jnp.roll fallback
        return None


def _pick_tile_h(H, W, *, max_plane_bytes=2 << 20, max_rows=512):
    """Largest multiple-of-8 divisor of H whose (th, W) f32 plane fits budget."""
    best = None
    for th in range(8, H + 1, 8):
        if H % th != 0:
            continue
        if th * W * 4 <= max_plane_bytes and th <= max_rows:
            best = th
        elif best is None:
            best = th          # nothing fits: smallest multiple-of-8 divisor
    return best if best is not None else H


# ----------------------------------------------------------------------------
# Kernel
# ----------------------------------------------------------------------------
def _fusion_loss_kernel(*refs, in_max, tile_h, acc_rows, halo_rows,
                        n_row_tiles, lane_mode, sub_mode):
    if n_row_tiles > 1:
        (y_ref, ir_ref, gen_ref,
         yt_ref, irt_ref, gent_ref,
         yb_ref, irb_ref, genb_ref,
         sum_in_ref, sum_grad_ref) = refs
    else:
        y_ref, ir_ref, gen_ref, sum_in_ref, sum_grad_ref = refs

    f32 = jnp.float32
    W = y_ref.shape[-1]
    th = tile_h
    j = pl.program_id(1)

    # masks hoisted once (broadcast_in_dim is not CSE'd)
    col = lax.broadcasted_iota(jnp.int32, (1, W), 1)
    row = lax.broadcasted_iota(jnp.int32, (th, 1), 0)
    not_right = col < W - 1
    not_left = col > 0
    is_top = row == 0
    is_bot = row == th - 1

    def _roll(a, shift, axis, mode):
        axis = axis % a.ndim
        if mode is None:
            return jnp.roll(a, shift, axis)
        if mode == "rev":
            shift = -shift
        return pltpu.roll(a, shift=shift % a.shape[axis], axis=axis)

    def lshift(a, mode):       # a[:, j + 1], zero at the right image border
        return jnp.where(not_right, _roll(a, -1, -1, mode), 0.0)

    def rshift(a, mode):       # a[:, j - 1], zero at the left image border
        return jnp.where(not_left, _roll(a, 1, -1, mode), 0.0)

    def up(a, edge):           # a[i - 1, :], `edge` row patched in at i == 0
        return jnp.where(is_top, edge, _roll(a, 1, -2, sub_mode))

    def down(a, edge):         # a[i + 1, :], `edge` row patched in at i == th-1
        return jnp.where(is_bot, edge, _roll(a, -1, -2, sub_mode))

    # halo rows (the image row just above / below this tile); zero at borders
    if n_row_tiles == 1:
        zero_row = jnp.zeros((1, W), f32)
        halos = [(zero_row, zero_row)] * 3
    else:
        top_ok = j > 0
        bot_ok = j < n_row_tiles - 1

        def halo(top_ref, bot_ref):
            t = jnp.where(top_ok,
                          top_ref[0, 0, halo_rows - 1:halo_rows, :].astype(f32),
                          0.0)
            b = jnp.where(bot_ok, bot_ref[0, 0, 0:1, :].astype(f32), 0.0)
            return t, b

        halos = [halo(yt_ref, yb_ref), halo(irt_ref, irb_ref),
                 halo(gent_ref, genb_ref)]

    def grad_map(x, top, bot):
        # separable Sobel: gx = up(h) + 2h + down(h),  gy = up(s) - down(s)
        xl, xr = lshift(x, lane_mode), rshift(x, lane_mode)
        h = xl - xr
        s = xl + 2.0 * x + xr
        tl, tr = lshift(top, None), rshift(top, None)
        bl, br = lshift(bot, None), rshift(bot, None)
        h_t, s_t = tl - tr, tl + 2.0 * top + tr
        h_b, s_b = bl - br, bl + 2.0 * bot + br
        gx = up(h, h_t) + 2.0 * h + down(h, h_b)
        gy = up(s, s_t) - down(s, s_b)
        return jnp.abs(gx) + jnp.abs(gy)

    y = y_ref[0, 0].astype(f32)
    ir = ir_ref[0, 0].astype(f32)
    gen = gen_ref[0, 0].astype(f32)

    y_g = grad_map(y, *halos[0])
    ir_g = grad_map(ir, *halos[1])
    gen_g = grad_map(gen, *halos[2])

    x_in = jnp.maximum(y, ir) if in_max else (y + ir) * 0.5
    diff_in = jnp.abs(x_in - gen)
    diff_grad = jnp.abs(jnp.maximum(y_g, ir_g) - gen_g)

    def fold(d):               # (th, W) -> (acc_rows, W), elementwise adds only
        if acc_rows == th:
            return d
        if acc_rows == 1:
            return jnp.sum(d, axis=0, keepdims=True)
        part = d[0:acc_rows, :]
        for k in range(1, th // acc_rows):
            part = part + d[k * acc_rows:(k + 1) * acc_rows, :]
        return part

    @pl.when(j == 0)
    def _():
        sum_in_ref[...] = jnp.zeros_like(sum_in_ref)
        sum_grad_ref[...] = jnp.zeros_like(sum_grad_ref)

    sum_in_ref[...] += fold(diff_in)[None]
    sum_grad_ref[...] += fold(diff_grad)[None]


# ----------------------------------------------------------------------------
# Wrapper
# ----------------------------------------------------------------------------
def fusion_loss(image_vis, image_ir, generate_img, *,
                coeff_int=1.0, coeff_grad=10.0, in_max=True, tile_h=None):
    B, _, H, W = image_vis.shape

    if tile_h is None:
        tile_h = _pick_tile_h(H, W)
    if H % tile_h != 0:
        raise ValueError(f"tile_h={tile_h} must divide H={H}")
    n_tiles = H // tile_h
    if n_tiles > 1 and tile_h % 8 != 0:
        raise ValueError("multi-tile path needs tile_h % 8 == 0")

    acc_rows = 8 if tile_h % 8 == 0 else 1
    halo_rows = 8 if n_tiles > 1 else min(8, H)

    roll_mode = _hw_roll_mode()
    lane_mode = roll_mode if (W % 128 == 0) else None
    sub_mode = roll_mode if (tile_h % 8 == 0) else None

    main_spec = pl.BlockSpec((1, 1, tile_h, W), lambda b, j: (b, 0, j, 0))
    in_specs = [main_spec, main_spec, main_spec]
    args = (image_vis, image_ir, generate_img)

    if n_tiles > 1:
        th8 = tile_h // 8
        nrb = H // 8
        top_spec = pl.BlockSpec(
            (1, 1, 8, W), lambda b, j: (b, 0, jnp.maximum(j * th8 - 1, 0), 0))
        bot_spec = pl.BlockSpec(
            (1, 1, 8, W), lambda b, j: (b, 0, jnp.minimum((j + 1) * th8, nrb - 1), 0))
        in_specs += [top_spec, top_spec, top_spec,
                     bot_spec, bot_spec, bot_spec]
        args = args + (image_vis, image_ir, generate_img,
                       image_vis, image_ir, generate_img)

    out_spec = pl.BlockSpec((1, acc_rows, W), lambda b, j: (b, 0, 0))

    kernel = functools.partial(
        _fusion_loss_kernel, in_max=in_max, tile_h=tile_h, acc_rows=acc_rows,
        halo_rows=halo_rows, n_row_tiles=n_tiles,
        lane_mode=lane_mode, sub_mode=sub_mode)

    sum_in, sum_grad = pl.pallas_call(
        kernel,
        out_shape=(jax.ShapeDtypeStruct((B, acc_rows, W), jnp.float32),
                   jax.ShapeDtypeStruct((B, acc_rows, W), jnp.float32)),
        grid=(B, n_tiles),
        in_specs=in_specs,
        out_specs=(out_spec, out_spec),
        compiler_params=pltpu.CompilerParams(
            dimension_semantics=("parallel", "arbitrary"),
            vmem_limit_bytes=48 * 1024 * 1024),
    )(*args)

    n = float(B * H * W)
    loss_in = jnp.sum(sum_in) / n
    loss_grad = jnp.sum(sum_grad) / n
    loss_total = coeff_int * loss_in + coeff_grad * loss_grad
    return loss_total, loss_in, loss_grad


# ----------------------------------------------------------------------------
# Pure-JAX reference mirroring the PyTorch module (for verification)
# ----------------------------------------------------------------------------
def _reference(image_vis, image_ir, generate_img, *,
               coeff_int=1.0, coeff_grad=10.0, in_max=True):
    kx = jnp.array([[-1., 0., 1.], [-2., 0., 2.], [-1., 0., 1.]], jnp.float32)
    ky = jnp.array([[1., 2., 1.], [0., 0., 0.], [-1., -2., -1.]], jnp.float32)

    def conv(x, k):  # x: (B,1,H,W)
        return lax.conv_general_dilated(
            x, k[None, None], window_strides=(1, 1), padding="SAME",
            dimension_numbers=("NCHW", "OIHW", "NCHW"),
            precision=lax.Precision.HIGHEST)

    def sobel(x):
        return jnp.abs(conv(x, kx)) + jnp.abs(conv(x, ky))

    y = image_vis[:, :1]
    x_in = jnp.maximum(y, image_ir) if in_max else (y + image_ir) / 2.0
    loss_in = jnp.mean(jnp.abs(x_in - generate_img))
    joint = jnp.maximum(sobel(y), sobel(image_ir))
    loss_grad = jnp.mean(jnp.abs(joint - sobel(generate_img)))
    return coeff_int * loss_in + coeff_grad * loss_grad, loss_in, loss_grad


if __name__ == "__main__":
    key = jax.random.PRNGKey(0)

    def run_case(B, C, H, W, tile_h=None, in_max=True, seed=0):
        k1, k2, k3 = jax.random.split(jax.random.fold_in(key, seed), 3)
        vis = jax.random.uniform(k1, (B, C, H, W), jnp.float32)
        ir = jax.random.uniform(k2, (B, 1, H, W), jnp.float32)
        gen = jax.random.uniform(k3, (B, 1, H, W), jnp.float32)
        got = fusion_loss(vis, ir, gen, in_max=in_max, tile_h=tile_h)
        jax.block_until_ready(got)
        ref = _reference(vis, ir, gen, in_max=in_max)
        for g, r in zip(got, ref):
            assert jnp.allclose(g, r, atol=1e-4, rtol=1e-4), (g, r)

    # small spatial, single row tile, lane-fallback path (W not a 128 multiple)
    run_case(B=2, C=3, H=16, W=16, seed=0)
    # multi row-tile path (halos + vreg accumulation) on a lane-aligned width
    run_case(B=2, C=3, H=32, W=128, tile_h=8, seed=1)
    # mean-fusion (in_max=False) variant
    run_case(B=1, C=1, H=16, W=16, in_max=False, seed=2)

    print("KERNEL_OK")
</pallas_src>

<mosaic_0001>
module attributes {stable_mosaic.version = 11 : i64} {
  func.func @_fusion_loss_kernel(%arg0: i32, %arg1: i32, %arg2: memref<1x1x16x16xf32, #tpu.memory_space<vmem>>, %arg3: memref<1x1x16x16xf32, #tpu.memory_space<vmem>>, %arg4: memref<1x1x16x16xf32, #tpu.memory_space<vmem>>, %arg5: memref<1x8x16xf32, #tpu.memory_space<vmem>>, %arg6: memref<1x8x16xf32, #tpu.memory_space<vmem>>) attributes {dimension_semantics = [#tpu.dimension_semantics<parallel>, #tpu.dimension_semantics<arbitrary>], iteration_bounds = array<i64: 2, 1>, scalar_prefetch = 0 : i64, scratch_operands = 0 : i64, tpu.core_type = #tpu.core_type<tc>, window_params = [{transform_indices = @transform_0, window_bounds = array<i64: 1, 1, 16, 16>}, {transform_indices = @transform_1, window_bounds = array<i64: 1, 1, 16, 16>}, {transform_indices = @transform_2, window_bounds = array<i64: 1, 1, 16, 16>}, {transform_indices = @transform_3, window_bounds = array<i64: 1, 8, 16>}, {transform_indices = @transform_4, window_bounds = array<i64: 1, 8, 16>}]} {
    %0 = tpu.iota {dimensions = array<i32: 1>} : vector<1x16xi32>
    %1 = tpu.iota {dimensions = array<i32: 0>} : vector<16x1xi32>
    %c15_i32 = arith.constant 15 : i32
    %2 = vector.broadcast %c15_i32 : i32 to vector<1x16xi32>
    %3 = arith.cmpi slt, %0, %2 : vector<1x16xi32>
    %c0_i32 = arith.constant 0 : i32
    %4 = vector.broadcast %c0_i32 : i32 to vector<1x16xi32>
    %5 = arith.cmpi sgt, %0, %4 : vector<1x16xi32>
    %c0_i32_0 = arith.constant 0 : i32
    %6 = vector.broadcast %c0_i32_0 : i32 to vector<16x1xi32>
    %7 = arith.cmpi eq, %1, %6 : vector<16x1xi32>
    %c15_i32_1 = arith.constant 15 : i32
    %8 = vector.broadcast %c15_i32_1 : i32 to vector<16x1xi32>
    %9 = arith.cmpi eq, %1, %8 : vector<16x1xi32>
    %cst = arith.constant 0.000000e+00 : f32
    %10 = vector.broadcast %cst : f32 to vector<1x16xf32>
    %c0 = arith.constant 0 : index
    %c0_2 = arith.constant 0 : index
    %c0_3 = arith.constant 0 : index
    %c0_4 = arith.constant 0 : index
    %11 = vector.load %arg2[%c0, %c0_2, %c0_3, %c0_4] : memref<1x1x16x16xf32, #tpu.memory_space<vmem>>, vector<1x1x16x16xf32>
    %12 = vector.shape_cast %11 : vector<1x1x16x16xf32> to vector<16x16xf32>
    %c0_5 = arith.constant 0 : index
    %c0_6 = arith.constant 0 : index
    %c0_7 = arith.constant 0 : index
    %c0_8 = arith.constant 0 : index
    %13 = vector.load %arg3[%c0_5, %c0_6, %c0_7, %c0_8] : memref<1x1x16x16xf32, #tpu.memory_space<vmem>>, vector<1x1x16x16xf32>
    %14 = vector.shape_cast %13 : vector<1x1x16x16xf32> to vector<16x16xf32>
    %c0_9 = arith.constant 0 : index
    %c0_10 = arith.constant 0 : index
    %c0_11 = arith.constant 0 : index
    %c0_12 = arith.constant 0 : index
    %15 = vector.load %arg4[%c0_9, %c0_10, %c0_11, %c0_12] : memref<1x1x16x16xf32, #tpu.memory_space<vmem>>, vector<1x1x16x16xf32>
    %16 = vector.shape_cast %15 : vector<1x1x16x16xf32> to vector<16x16xf32>
    %17 = vector.extract_strided_slice %12 {offsets = [0, 1], sizes = [16, 15], strides = [1, 1]} : vector<16x16xf32> to vector<16x15xf32>
    %18 = vector.extract_strided_slice %12 {offsets = [0, 0], sizes = [16, 1], strides = [1, 1]} : vector<16x16xf32> to vector<16x1xf32>
    %19 = tpu.concatenate %17, %18 in 1 : vector<16x15xf32>, vector<16x1xf32> -> vector<16x16xf32>
    %cst_13 = arith.constant 0.000000e+00 : f32
    %20 = vector.shape_cast %3 : vector<1x16xi1> to vector<1x16xi1>
    %21 = vector.broadcast %20 : vector<1x16xi1> to vector<16x16xi1>
    %22 = vector.broadcast %cst_13 : f32 to vector<16x16xf32>
    %23 = arith.select %21, %19, %22 : vector<16x16xi1>, vector<16x16xf32>
    %24 = vector.extract_strided_slice %12 {offsets = [0, 15], sizes = [16, 1], strides = [1, 1]} : vector<16x16xf32> to vector<16x1xf32>
    %25 = vector.extract_strided_slice %12 {offsets = [0, 0], sizes = [16, 15], strides = [1, 1]} : vector<16x16xf32> to vector<16x15xf32>
    %26 = tpu.concatenate %24, %25 in 1 : vector<16x1xf32>, vector<16x15xf32> -> vector<16x16xf32>
    %cst_14 = arith.constant 0.000000e+00 : f32
    %27 = vector.shape_cast %5 : vector<1x16xi1> to vector<1x16xi1>
    %28 = vector.broadcast %27 : vector<1x16xi1> to vector<16x16xi1>
    %29 = vector.broadcast %cst_14 : f32 to vector<16x16xf32>
    %30 = arith.select %28, %26, %29 : vector<16x16xi1>, vector<16x16xf32>
    %31 = arith.subf %23, %30 : vector<16x16xf32>
    %cst_15 = arith.constant 2.000000e+00 : f32
    %32 = vector.broadcast %cst_15 : f32 to vector<16x16xf32>
    %33 = arith.mulf %32, %12 : vector<16x16xf32>
    %34 = arith.addf %23, %33 : vector<16x16xf32>
    %35 = arith.addf %34, %30 : vector<16x16xf32>
    %36 = vector.extract_strided_slice %10 {offsets = [0, 1], sizes = [1, 15], strides = [1, 1]} : vector<1x16xf32> to vector<1x15xf32>
    %37 = vector.extract_strided_slice %10 {offsets = [0, 0], sizes = [1, 1], strides = [1, 1]} : vector<1x16xf32> to vector<1x1xf32>
    %38 = tpu.concatenate %36, %37 in 1 : vector<1x15xf32>, vector<1x1xf32> -> vector<1x16xf32>
    %cst_16 = arith.constant 0.000000e+00 : f32
    %39 = vector.broadcast %cst_16 : f32 to vector<1x16xf32>
    %40 = arith.select %3, %38, %39 : vector<1x16xi1>, vector<1x16xf32>
    %41 = vector.extract_strided_slice %10 {offsets = [0, 15], sizes = [1, 1], strides = [1, 1]} : vector<1x16xf32> to vector<1x1xf32>
    %42 = vector.extract_strided_slice %10 {offsets = [0, 0], sizes = [1, 15], strides = [1, 1]} : vector<1x16xf32> to vector<1x15xf32>
    %43 = tpu.concatenate %41, %42 in 1 : vector<1x1xf32>, vector<1x15xf32> -> vector<1x16xf32>
    %cst_17 = arith.constant 0.000000e+00 : f32
    %44 = vector.broadcast %cst_17 : f32 to vector<1x16xf32>
    %45 = arith.select %5, %43, %44 : vector<1x16xi1>, vector<1x16xf32>
    %46 = vector.extract_strided_slice %10 {offsets = [0, 1], sizes = [1, 15], strides = [1, 1]} : vector<1x16xf32> to vector<1x15xf32>
    %47 = vector.extract_strided_slice %10 {offsets = [0, 0], sizes = [1, 1], strides = [1, 1]} : vector<1x16xf32> to vector<1x1xf32>
    %48 = tpu.concatenate %46, %47 in 1 : vector<1x15xf32>, vector<1x1xf32> -> vector<1x16xf32>
    %cst_18 = arith.constant 0.000000e+00 : f32
    %49 = vector.broadcast %cst_18 : f32 to vector<1x16xf32>
    %50 = arith.select %3, %48, %49 : vector<1x16xi1>, vector<1x16xf32>
    %51 = vector.extract_strided_slice %10 {offsets = [0, 15], sizes = [1, 1], strides = [1, 1]} : vector<1x16xf32> to vector<1x1xf32>
    %52 = vector.extract_strided_slice %10 {offsets = [0, 0], sizes = [1, 15], strides = [1, 1]} : vector<1x16xf32> to vector<1x15xf32>
    %53 = tpu.concatenate %51, %52 in 1 : vector<1x1xf32>, vector<1x15xf32> -> vector<1x16xf32>
    %cst_19 = arith.constant 0.000000e+00 : f32
    %54 = vector.broadcast %cst_19 : f32 to vector<1x16xf32>
    %55 = arith.select %5, %53, %54 : vector<1x16xi1>, vector<1x16xf32>
    %56 = arith.subf %40, %45 : vector<1x16xf32>
    %cst_20 = arith.constant 2.000000e+00 : f32
    %57 = vector.broadcast %cst_20 : f32 to vector<1x16xf32>
    %58 = arith.mulf %57, %10 : vector<1x16xf32>
    %59 = arith.addf %40, %58 : vector<1x16xf32>
    %60 = arith.addf %59, %45 : vector<1x16xf32>
    %61 = arith.subf %50, %55 : vector<1x16xf32>
    %cst_21 = arith.constant 2.000000e+00 : f32
    %62 = vector.broadcast %cst_21 : f32 to vector<1x16xf32>
    %63 = arith.mulf %62, %10 : vector<1x16xf32>
    %64 = arith.addf %50, %63 : vector<1x16xf32>
    %65 = arith.addf %64, %55 : vector<1x16xf32>
    %66 = vector.extract_strided_slice %31 {offsets = [15, 0], sizes = [1, 16], strides = [1, 1]} : vector<16x16xf32> to vector<1x16xf32>
    %67 = vector.extract_strided_slice %31 {offsets = [0, 0], sizes = [15, 16], strides = [1, 1]} : vector<16x16xf32> to vector<15x16xf32>
    %68 = tpu.concatenate %66, %67 in 0 : vector<1x16xf32>, vector<15x16xf32> -> vector<16x16xf32>
    %69 = vector.shape_cast %7 : vector<16x1xi1> to vector<16x1xi1>
    %70 = vector.broadcast %69 : vector<16x1xi1> to vector<16x16xi1>
    %71 = vector.shape_cast %56 : vector<1x16xf32> to vector<1x16xf32>
    %72 = vector.broadcast %71 : vector<1x16xf32> to vector<16x16xf32>
    %73 = arith.select %70, %72, %68 : vector<16x16xi1>, vector<16x16xf32>
    %cst_22 = arith.constant 2.000000e+00 : f32
    %74 = vector.broadcast %cst_22 : f32 to vector<16x16xf32>
    %75 = arith.mulf %74, %31 : vector<16x16xf32>
    %76 = arith.addf %73, %75 : vector<16x16xf32>
    %77 = vector.extract_strided_slice %31 {offsets = [1, 0], sizes = [15, 16], strides = [1, 1]} : vector<16x16xf32> to vector<15x16xf32>
    %78 = vector.extract_strided_slice %31 {offsets = [0, 0], sizes = [1, 16], strides = [1, 1]} : vector<16x16xf32> to vector<1x16xf32>
    %79 = tpu.concatenate %77, %78 in 0 : vector<15x16xf32>, vector<1x16xf32> -> vector<16x16xf32>
    %80 = vector.shape_cast %9 : vector<16x1xi1> to vector<16x1xi1>
    %81 = vector.broadcast %80 : vector<16x1xi1> to vector<16x16xi1>
    %82 = vector.shape_cast %61 : vector<1x16xf32> to vector<1x16xf32>
    %83 = vector.broadcast %82 : vector<1x16xf32> to vector<16x16xf32>
    %84 = arith.select %81, %83, %79 : vector<16x16xi1>, vector<16x16xf32>
    %85 = arith.addf %76, %84 : vector<16x16xf32>
    %86 = vector.extract_strided_slice %35 {offsets = [15, 0], sizes = [1, 16], strides = [1, 1]} : vector<16x16xf32> to vector<1x16xf32>
    %87 = vector.extract_strided_slice %35 {offsets = [0, 0], sizes = [15, 16], strides = [1, 1]} : vector<16x16xf32> to vector<15x16xf32>
    %88 = tpu.concatenate %86, %87 in 0 : vector<1x16xf32>, vector<15x16xf32> -> vector<16x16xf32>
    %89 = vector.shape_cast %7 : vector<16x1xi1> to vector<16x1xi1>
    %90 = vector.broadcast %89 : vector<16x1xi1> to vector<16x16xi1>
    %91 = vector.shape_cast %60 : vector<1x16xf32> to vector<1x16xf32>
    %92 = vector.broadcast %91 : vector<1x16xf32> to vector<16x16xf32>
    %93 = arith.select %90, %92, %88 : vector<16x16xi1>, vector<16x16xf32>
    %94 = vector.extract_strided_slice %35 {offsets = [1, 0], sizes = [15, 16], strides = [1, 1]} : vector<16x16xf32> to vector<15x16xf32>
    %95 = vector.extract_strided_slice %35 {offsets = [0, 0], sizes = [1, 16], strides = [1, 1]} : vector<16x16xf32> to vector<1x16xf32>
    %96 = tpu.concatenate %94, %95 in 0 : vector<15x16xf32>, vector<1x16xf32> -> vector<16x16xf32>
    %97 = vector.shape_cast %9 : vector<16x1xi1> to vector<16x1xi1>
    %98 = vector.broadcast %97 : vector<16x1xi1> to vector<16x16xi1>
    %99 = vector.shape_cast %65 : vector<1x16xf32> to vector<1x16xf32>
    %100 = vector.broadcast %99 : vector<1x16xf32> to vector<16x16xf32>
    %101 = arith.select %98, %100, %96 : vector<16x16xi1>, vector<16x16xf32>
    %102 = arith.subf %93, %101 : vector<16x16xf32>
    %103 = math.absf %85 : vector<16x16xf32>
    %104 = math.absf %102 : vector<16x16xf32>
    %105 = arith.addf %103, %104 : vector<16x16xf32>
    %106 = vector.extract_strided_slice %14 {offsets = [0, 1], sizes = [16, 15], strides = [1, 1]} : vector<16x16xf32> to vector<16x15xf32>
    %107 = vector.extract_strided_slice %14 {offsets = [0, 0], sizes = [16, 1], strides = [1, 1]} : vector<16x16xf32> to vector<16x1xf32>
    %108 = tpu.concatenate %106, %107 in 1 : vector<16x15xf32>, vector<16x1xf32> -> vector<16x16xf32>
    %cst_23 = arith.constant 0.000000e+00 : f32
    %109 = vector.shape_cast %3 : vector<1x16xi1> to vector<1x16xi1>
    %110 = vector.broadcast %109 : vector<1x16xi1> to vector<16x16xi1>
    %111 = vector.broadcast %cst_23 : f32 to vector<16x16xf32>
    %112 = arith.select %110, %108, %111 : vector<16x16xi1>, vector<16x16xf32>
    %113 = vector.extract_strided_slice %14 {offsets = [0, 15], sizes = [16, 1], strides = [1, 1]} : vector<16x16xf32> to vector<16x1xf32>
    %114 = vector.extract_strided_slice %14 {offsets = [0, 0], sizes = [16, 15], strides = [1, 1]} : vector<16x16xf32> to vector<16x15xf32>
    %115 = tpu.concatenate %113, %114 in 1 : vector<16x1xf32>, vector<16x15xf32> -> vector<16x16xf32>
    %cst_24 = arith.constant 0.000000e+00 : f32
    %116 = vector.shape_cast %5 : vector<1x16xi1> to vector<1x16xi1>
    %117 = vector.broadcast %116 : vector<1x16xi1> to vector<16x16xi1>
    %118 = vector.broadcast %cst_24 : f32 to vector<16x16xf32>
    %119 = arith.select %117, %115, %118 : vector<16x16xi1>, vector<16x16xf32>
    %120 = arith.subf %112, %119 : vector<16x16xf32>
    %cst_25 = arith.constant 2.000000e+00 : f32
    %121 = vector.broadcast %cst_25 : f32 to vector<16x16xf32>
    %122 = arith.mulf %121, %14 : vector<16x16xf32>
    %123 = arith.addf %112, %122 : vector<16x16xf32>
    %124 = arith.addf %123, %119 : vector<16x16xf32>
    %125 = vector.extract_strided_slice %10 {offsets = [0, 1], sizes = [1, 15], strides = [1, 1]} : vector<1x16xf32> to vector<1x15xf32>
    %126 = vector.extract_strided_slice %10 {offsets = [0, 0], sizes = [1, 1], strides = [1, 1]} : vector<1x16xf32> to vector<1x1xf32>
    %127 = tpu.concatenate %125, %126 in 1 : vector<1x15xf32>, vector<1x1xf32> -> vector<1x16xf32>
    %cst_26 = arith.constant 0.000000e+00 : f32
    %128 = vector.broadcast %cst_26 : f32 to vector<1x16xf32>
    %129 = arith.select %3, %127, %128 : vector<1x16xi1>, vector<1x16xf32>
    %130 = vector.extract_strided_slice %10 {offsets = [0, 15], sizes = [1, 1], strides = [1, 1]} : vector<1x16xf32> to vector<1x1xf32>
    %131 = vector.extract_strided_slice %10 {offsets = [0, 0], sizes = [1, 15], strides = [1, 1]} : vector<1x16xf32> to vector<1x15xf32>
    %132 = tpu.concatenate %130, %131 in 1 : vector<1x1xf32>, vector<1x15xf32> -> vector<1x16xf32>
    %cst_27 = arith.constant 0.000000e+00 : f32
    %133 = vector.broadcast %cst_27 : f32 to vector<1x16xf32>
    %134 = arith.select %5, %132, %133 : vector<1x16xi1>, vector<1x16xf32>
    %135 = vector.extract_strided_slice %10 {offsets = [0, 1], sizes = [1, 15], strides = [1, 1]} : vector<1x16xf32> to vector<1x15xf32>
    %136 = vector.extract_strided_slice %10 {offsets = [0, 0], sizes = [1, 1], strides = [1, 1]} : vector<1x16xf32> to vector<1x1xf32>
    %137 = tpu.concatenate %135, %136 in 1 : vector<1x15xf32>, vector<1x1xf32> -> vector<1x16xf32>
    %cst_28 = arith.constant 0.000000e+00 : f32
    %138 = vector.broadcast %cst_28 : f32 to vector<1x16xf32>
    %139 = arith.select %3, %137, %138 : vector<1x16xi1>, vector<1x16xf32>
    %140 = vector.extract_strided_slice %10 {offsets = [0, 15], sizes = [1, 1], strides = [1, 1]} : vector<1x16xf32> to vector<1x1xf32>
    %141 = vector.extract_strided_slice %10 {offsets = [0, 0], sizes = [1, 15], strides = [1, 1]} : vector<1x16xf32> to vector<1x15xf32>
    %142 = tpu.concatenate %140, %141 in 1 : vector<1x1xf32>, vector<1x15xf32> -> vector<1x16xf32>
    %cst_29 = arith.constant 0.000000e+00 : f32
    %143 = vector.broadcast %cst_29 : f32 to vector<1x16xf32>
    %144 = arith.select %5, %142, %143 : vector<1x16xi1>, vector<1x16xf32>
    %145 = arith.subf %129, %134 : vector<1x16xf32>
    %cst_30 = arith.constant 2.000000e+00 : f32
    %146 = vector.broadcast %cst_30 : f32 to vector<1x16xf32>
    %147 = arith.mulf %146, %10 : vector<1x16xf32>
    %148 = arith.addf %129, %147 : vector<1x16xf32>
    %149 = arith.addf %148, %134 : vector<1x16xf32>
    %150 = arith.subf %139, %144 : vector<1x16xf32>
    %cst_31 = arith.constant 2.000000e+00 : f32
    %151 = vector.broadcast %cst_31 : f32 to vector<1x16xf32>
    %152 = arith.mulf %151, %10 : vector<1x16xf32>
    %153 = arith.addf %139, %152 : vector<1x16xf32>
    %154 = arith.addf %153, %144 : vector<1x16xf32>
    %155 = vector.extract_strided_slice %120 {offsets = [15, 0], sizes = [1, 16], strides = [1, 1]} : vector<16x16xf32> to vector<1x16xf32>
    %156 = vector.extract_strided_slice %120 {offsets = [0, 0], sizes = [15, 16], strides = [1, 1]} : vector<16x16xf32> to vector<15x16xf32>
    %157 = tpu.concatenate %155, %156 in 0 : vector<1x16xf32>, vector<15x16xf32> -> vector<16x16xf32>
    %158 = vector.shape_cast %7 : vector<16x1xi1> to vector<16x1xi1>
    %159 = vector.broadcast %158 : vector<16x1xi1> to vector<16x16xi1>
    %160 = vector.shape_cast %145 : vector<1x16xf32> to vector<1x16xf32>
    %161 = vector.broadcast %160 : vector<1x16xf32> to vector<16x16xf32>
    %162 = arith.select %159, %161, %157 : vector<16x16xi1>, vector<16x16xf32>
    %cst_32 = arith.constant 2.000000e+00 : f32
    %163 = vector.broadcast %cst_32 : f32 to vector<16x16xf32>
    %164 = arith.mulf %163, %120 : vector<16x16xf32>
    %165 = arith.addf %162, %164 : vector<16x16xf32>
    %166 = vector.extract_strided_slice %120 {offsets = [1, 0], sizes = [15, 16], strides = [1, 1]} : vector<16x16xf32> to vector<15x16xf32>
    %167 = vector.extract_strided_slice %120 {offsets = [0, 0], sizes = [1, 16], strides = [1, 1]} : vector<16x16xf32> to vector<1x16xf32>
    %168 = tpu.concatenate %166, %167 in 0 : vector<15x16xf32>, vector<1x16xf32> -> vector<16x16xf32>
    %169 = vector.shape_cast %9 : vector<16x1xi1> to vector<16x1xi1>
    %170 = vector.broadcast %169 : vector<16x1xi1> to vector<16x16xi1>
    %171 = vector.shape_cast %150 : vector<1x16xf32> to vector<1x16xf32>
    %172 = vector.broadcast %171 : vector<1x16xf32> to vector<16x16xf32>
    %173 = arith.select %170, %172, %168 : vector<16x16xi1>, vector<16x16xf32>
    %174 = arith.addf %165, %173 : vector<16x16xf32>
    %175 = vector.extract_strided_slice %124 {offsets = [15, 0], sizes = [1, 16], strides = [1, 1]} : vector<16x16xf32> to vector<1x16xf32>
    %176 = vector.extract_strided_slice %124 {offsets = [0, 0], sizes = [15, 16], strides = [1, 1]} : vector<16x16xf32> to vector<15x16xf32>
    %177 = tpu.concatenate %175, %176 in 0 : vector<1x16xf32>, vector<15x16xf32> -> vector<16x16xf32>
    %178 = vector.shape_cast %7 : vector<16x1xi1> to vector<16x1xi1>
    %179 = vector.broadcast %178 : vector<16x1xi1> to vector<16x16xi1>
    %180 = vector.shape_cast %149 : vector<1x16xf32> to vector<1x16xf32>
    %181 = vector.broadcast %180 : vector<1x16xf32> to vector<16x16xf32>
    %182 = arith.select %179, %181, %177 : vector<16x16xi1>, vector<16x16xf32>
    %183 = vector.extract_strided_slice %124 {offsets = [1, 0], sizes = [15, 16], strides = [1, 1]} : vector<16x16xf32> to vector<15x16xf32>
    %184 = vector.extract_strided_slice %124 {offsets = [0, 0], sizes = [1, 16], strides = [1, 1]} : vector<16x16xf32> to vector<1x16xf32>
    %185 = tpu.concatenate %183, %184 in 0 : vector<15x16xf32>, vector<1x16xf32> -> vector<16x16xf32>
    %186 = vector.shape_cast %9 : vector<16x1xi1> to vector<16x1xi1>
    %187 = vector.broadcast %186 : vector<16x1xi1> to vector<16x16xi1>
    %188 = vector.shape_cast %154 : vector<1x16xf32> to vector<1x16xf32>
    %189 = vector.broadcast %188 : vector<1x16xf32> to vector<16x16xf32>
    %190 = arith.select %187, %189, %185 : vector<16x16xi1>, vector<16x16xf32>
    %191 = arith.subf %182, %190 : vector<16x16xf32>
    %192 = math.absf %174 : vector<16x16xf32>
    %193 = math.absf %191 : vector<16x16xf32>
    %194 = arith.addf %192, %193 : vector<16x16xf32>
    %195 = vector.extract_strided_slice %16 {offsets = [0, 1], sizes = [16, 15], strides = [1, 1]} : vector<16x16xf32> to vector<16x15xf32>
    %196 = vector.extract_strided_slice %16 {offsets = [0, 0], sizes = [16, 1], strides = [1, 1]} : vector<16x16xf32> to vector<16x1xf32>
    %197 = tpu.concatenate %195, %196 in 1 : vector<16x15xf32>, vector<16x1xf32> -> vector<16x16xf32>
    %cst_33 = arith.constant 0.000000e+00 : f32
    %198 = vector.shape_cast %3 : vector<1x16xi1> to vector<1x16xi1>
    %199 = vector.broadcast %198 : vector<1x16xi1> to vector<16x16xi1>
    %200 = vector.broadcast %cst_33 : f32 to vector<16x16xf32>
    %201 = arith.select %199, %197, %200 : vector<16x16xi1>, vector<16x16xf32>
    %202 = vector.extract_strided_slice %16 {offsets = [0, 15], sizes = [16, 1], strides = [1, 1]} : vector<16x16xf32> to vector<16x1xf32>
    %203 = vector.extract_strided_slice %16 {offsets = [0, 0], sizes = [16, 15], strides = [1, 1]} : vector<16x16xf32> to vector<16x15xf32>
    %204 = tpu.concatenate %202, %203 in 1 : vector<16x1xf32>, vector<16x15xf32> -> vector<16x16xf32>
    %cst_34 = arith.constant 0.000000e+00 : f32
    %205 = vector.shape_cast %5 : vector<1x16xi1> to vector<1x16xi1>
    %206 = vector.broadcast %205 : vector<1x16xi1> to vector<16x16xi1>
    %207 = vector.broadcast %cst_34 : f32 to vector<16x16xf32>
    %208 = arith.select %206, %204, %207 : vector<16x16xi1>, vector<16x16xf32>
    %209 = arith.subf %201, %208 : vector<16x16xf32>
    %cst_35 = arith.constant 2.000000e+00 : f32
    %210 = vector.broadcast %cst_35 : f32 to vector<16x16xf32>
    %211 = arith.mulf %210, %16 : vector<16x16xf32>
    %212 = arith.addf %201, %211 : vector<16x16xf32>
    %213 = arith.addf %212, %208 : vector<16x16xf32>
    %214 = vector.extract_strided_slice %10 {offsets = [0, 1], sizes = [1, 15], strides = [1, 1]} : vector<1x16xf32> to vector<1x15xf32>
    %215 = vector.extract_strided_slice %10 {offsets = [0, 0], sizes = [1, 1], strides = [1, 1]} : vector<1x16xf32> to vector<1x1xf32>
    %216 = tpu.concatenate %214, %215 in 1 : vector<1x15xf32>, vector<1x1xf32> -> vector<1x16xf32>
    %cst_36 = arith.constant 0.000000e+00 : f32
    %217 = vector.broadcast %cst_36 : f32 to vector<1x16xf32>
    %218 = arith.select %3, %216, %217 : vector<1x16xi1>, vector<1x16xf32>
    %219 = vector.extract_strided_slice %10 {offsets = [0, 15], sizes = [1, 1], strides = [1, 1]} : vector<1x16xf32> to vector<1x1xf32>
    %220 = vector.extract_strided_slice %10 {offsets = [0, 0], sizes = [1, 15], strides = [1, 1]} : vector<1x16xf32> to vector<1x15xf32>
    %221 = tpu.concatenate %219, %220 in 1 : vector<1x1xf32>, vector<1x15xf32> -> vector<1x16xf32>
    %cst_37 = arith.constant 0.000000e+00 : f32
    %222 = vector.broadcast %cst_37 : f32 to vector<1x16xf32>
    %223 = arith.select %5, %221, %222 : vector<1x16xi1>, vector<1x16xf32>
    %224 = vector.extract_strided_slice %10 {offsets = [0, 1], sizes = [1, 15], strides = [1, 1]} : vector<1x16xf32> to vector<1x15xf32>
    %225 = vector.extract_strided_slice %10 {offsets = [0, 0], sizes = [1, 1], strides = [1, 1]} : vector<1x16xf32> to vector<1x1xf32>
    %226 = tpu.concatenate %224, %225 in 1 : vector<1x15xf32>, vector<1x1xf32> -> vector<1x16xf32>
    %cst_38 = arith.constant 0.000000e+00 : f32
    %227 = vector.broadcast %cst_38 : f32 to vector<1x16xf32>
    %228 = arith.select %3, %226, %227 : vector<1x16xi1>, vector<1x16xf32>
    %229 = vector.extract_strided_slice %10 {offsets = [0, 15], sizes = [1, 1], strides = [1, 1]} : vector<1x16xf32> to vector<1x1xf32>
    %230 = vector.extract_strided_slice %10 {offsets = [0, 0], sizes = [1, 15], strides = [1, 1]} : vector<1x16xf32> to vector<1x15xf32>
    %231 = tpu.concatenate %229, %230 in 1 : vector<1x1xf32>, vector<1x15xf32> -> vector<1x16xf32>
    %cst_39 = arith.constant 0.000000e+00 : f32
    %232 = vector.broadcast %cst_39 : f32 to vector<1x16xf32>
    %233 = arith.select %5, %231, %232 : vector<1x16xi1>, vector<1x16xf32>
    %234 = arith.subf %218, %223 : vector<1x16xf32>
    %cst_40 = arith.constant 2.000000e+00 : f32
    %235 = vector.broadcast %cst_40 : f32 to vector<1x16xf32>
    %236 = arith.mulf %235, %10 : vector<1x16xf32>
    %237 = arith.addf %218, %236 : vector<1x16xf32>
    %238 = arith.addf %237, %223 : vector<1x16xf32>
    %239 = arith.subf %228, %233 : vector<1x16xf32>
    %cst_41 = arith.constant 2.000000e+00 : f32
    %240 = vector.broadcast %cst_41 : f32 to vector<1x16xf32>
    %241 = arith.mulf %240, %10 : vector<1x16xf32>
    %242 = arith.addf %228, %241 : vector<1x16xf32>
    %243 = arith.addf %242, %233 : vector<1x16xf32>
    %244 = vector.extract_strided_slice %209 {offsets = [15, 0], sizes = [1, 16], strides = [1, 1]} : vector<16x16xf32> to vector<1x16xf32>
    %245 = vector.extract_strided_slice %209 {offsets = [0, 0], sizes = [15, 16], strides = [1, 1]} : vector<16x16xf32> to vector<15x16xf32>
    %246 = tpu.concatenate %244, %245 in 0 : vector<1x16xf32>, vector<15x16xf32> -> vector<16x16xf32>
    %247 = vector.shape_cast %7 : vector<16x1xi1> to vector<16x1xi1>
    %248 = vector.broadcast %247 : vector<16x1xi1> to vector<16x16xi1>
    %249 = vector.shape_cast %234 : vector<1x16xf32> to vector<1x16xf32>
    %250 = vector.broadcast %249 : vector<1x16xf32> to vector<16x16xf32>
    %251 = arith.select %248, %250, %246 : vector<16x16xi1>, vector<16x16xf32>
    %cst_42 = arith.constant 2.000000e+00 : f32
    %252 = vector.broadcast %cst_42 : f32 to vector<16x16xf32>
    %253 = arith.mulf %252, %209 : vector<16x16xf32>
    %254 = arith.addf %251, %253 : vector<16x16xf32>
    %255 = vector.extract_strided_slice %209 {offsets = [1, 0], sizes = [15, 16], strides = [1, 1]} : vector<16x16xf32> to vector<15x16xf32>
    %256 = vector.extract_strided_slice %209 {offsets = [0, 0], sizes = [1, 16], strides = [1, 1]} : vector<16x16xf32> to vector<1x16xf32>
    %257 = tpu.concatenate %255, %256 in 0 : vector<15x16xf32>, vector<1x16xf32> -> vector<16x16xf32>
    %258 = vector.shape_cast %9 : vector<16x1xi1> to vector<16x1xi1>
    %259 = vector.broadcast %258 : vector<16x1xi1> to vector<16x16xi1>
    %260 = vector.shape_cast %239 : vector<1x16xf32> to vector<1x16xf32>
    %261 = vector.broadcast %260 : vector<1x16xf32> to vector<16x16xf32>
    %262 = arith.select %259, %261, %257 : vector<16x16xi1>, vector<16x16xf32>
    %263 = arith.addf %254, %262 : vector<16x16xf32>
    %264 = vector.extract_strided_slice %213 {offsets = [15, 0], sizes = [1, 16], strides = [1, 1]} : vector<16x16xf32> to vector<1x16xf32>
    %265 = vector.extract_strided_slice %213 {offsets = [0, 0], sizes = [15, 16], strides = [1, 1]} : vector<16x16xf32> to vector<15x16xf32>
    %266 = tpu.concatenate %264, %265 in 0 : vector<1x16xf32>, vector<15x16xf32> -> vector<16x16xf32>
    %267 = vector.shape_cast %7 : vector<16x1xi1> to vector<16x1xi1>
    %268 = vector.broadcast %267 : vector<16x1xi1> to vector<16x16xi1>
    %269 = vector.shape_cast %238 : vector<1x16xf32> to vector<1x16xf32>
    %270 = vector.broadcast %269 : vector<1x16xf32> to vector<16x16xf32>
    %271 = arith.select %268, %270, %266 : vector<16x16xi1>, vector<16x16xf32>
    %272 = vector.extract_strided_slice %213 {offsets = [1, 0], sizes = [15, 16], strides = [1, 1]} : vector<16x16xf32> to vector<15x16xf32>
    %273 = vector.extract_strided_slice %213 {offsets = [0, 0], sizes = [1, 16], strides = [1, 1]} : vector<16x16xf32> to vector<1x16xf32>
    %274 = tpu.concatenate %272, %273 in 0 : vector<15x16xf32>, vector<1x16xf32> -> vector<16x16xf32>
    %275 = vector.shape_cast %9 : vector<16x1xi1> to vector<16x1xi1>
    %276 = vector.broadcast %275 : vector<16x1xi1> to vector<16x16xi1>
    %277 = vector.shape_cast %243 : vector<1x16xf32> to vector<1x16xf32>
    %278 = vector.broadcast %277 : vector<1x16xf32> to vector<16x16xf32>
    %279 = arith.select %276, %278, %274 : vector<16x16xi1>, vector<16x16xf32>
    %280 = arith.subf %271, %279 : vector<16x16xf32>
    %281 = math.absf %263 : vector<16x16xf32>
    %282 = math.absf %280 : vector<16x16xf32>
    %283 = arith.addf %281, %282 : vector<16x16xf32>
    %284 = arith.maximumf %12, %14 : vector<16x16xf32>
    %285 = arith.subf %284, %16 : vector<16x16xf32>
    %286 = math.absf %285 : vector<16x16xf32>
    %287 = arith.maximumf %105, %194 : vector<16x16xf32>
    %288 = arith.subf %287, %283 : vector<16x16xf32>
    %289 = math.absf %288 : vector<16x16xf32>
    %c0_i32_43 = arith.constant 0 : i32
    %290 = arith.cmpi eq, %arg1, %c0_i32_43 : i32
    %291 = arith.extui %290 : i1 to i32
    %c0_i32_44 = arith.constant 0 : i32
    %292 = arith.cmpi ne, %291, %c0_i32_44 : i32
    scf.if %292 {
      %cst_57 = arith.constant 0.000000e+00 : f32
      %307 = vector.broadcast %cst_57 : f32 to vector<1x8x16xf32>
      %c0_58 = arith.constant 0 : index
      %c0_59 = arith.constant 0 : index
      %c0_60 = arith.constant 0 : index
      %308 = vector.load %arg5[%c0_58, %c0_59, %c0_60] : memref<1x8x16xf32, #tpu.memory_space<vmem>>, vector<1x8x16xf32>
      tpu.vector_store %arg5[%c0_58, %c0_59, %c0_60], %307 {strides = array<i32>} : memref<1x8x16xf32, #tpu.memory_space<vmem>>, vector<1x8x16xf32>,
      %cst_61 = arith.constant 0.000000e+00 : f32
      %309 = vector.broadcast %cst_61 : f32 to vector<1x8x16xf32>
      %c0_62 = arith.constant 0 : index
      %c0_63 = arith.constant 0 : index
      %c0_64 = arith.constant 0 : index
      %310 = vector.load %arg6[%c0_62, %c0_63, %c0_64] : memref<1x8x16xf32, #tpu.memory_space<vmem>>, vector<1x8x16xf32>
      tpu.vector_store %arg6[%c0_62, %c0_63, %c0_64], %309 {strides = array<i32>} : memref<1x8x16xf32, #tpu.memory_space<vmem>>, vector<1x8x16xf32>,
    } else {
    }
    %c0_45 = arith.constant 0 : index
    %c0_46 = arith.constant 0 : index
    %c0_47 = arith.constant 0 : index
    %293 = vector.load %arg5[%c0_45, %c0_46, %c0_47] : memref<1x8x16xf32, #tpu.memory_space<vmem>>, vector<1x8x16xf32>
    %294 = vector.extract_strided_slice %286 {offsets = [0, 0], sizes = [8, 16], strides = [1, 1]} : vector<16x16xf32> to vector<8x16xf32>
    %295 = vector.extract_strided_slice %286 {offsets = [8, 0], sizes = [8, 16], strides = [1, 1]} : vector<16x16xf32> to vector<8x16xf32>
    %296 = arith.addf %294, %295 : vector<8x16xf32>
    %297 = vector.shape_cast %296 : vector<8x16xf32> to vector<1x8x16xf32>
    %298 = arith.addf %293, %297 : vector<1x8x16xf32>
    %c0_48 = arith.constant 0 : index
    %c0_49 = arith.constant 0 : index
    %c0_50 = arith.constant 0 : index
    %299 = vector.load %arg5[%c0_48, %c0_49, %c0_50] : memref<1x8x16xf32, #tpu.memory_space<vmem>>, vector<1x8x16xf32>
    tpu.vector_store %arg5[%c0_48, %c0_49, %c0_50], %298 {strides = array<i32>} : memref<1x8x16xf32, #tpu.memory_space<vmem>>, vector<1x8x16xf32>,
    %c0_51 = arith.constant 0 : index
    %c0_52 = arith.constant 0 : index
    %c0_53 = arith.constant 0 : index
    %300 = vector.load %arg6[%c0_51, %c0_52, %c0_53] : memref<1x8x16xf32, #tpu.memory_space<vmem>>, vector<1x8x16xf32>
    %301 = vector.extract_strided_slice %289 {offsets = [0, 0], sizes = [8, 16], strides = [1, 1]} : vector<16x16xf32> to vector<8x16xf32>
    %302 = vector.extract_strided_slice %289 {offsets = [8, 0], sizes = [8, 16], strides = [1, 1]} : vector<16x16xf32> to vector<8x16xf32>
    %303 = arith.addf %301, %302 : vector<8x16xf32>
    %304 = vector.shape_cast %303 : vector<8x16xf32> to vector<1x8x16xf32>
    %305 = arith.addf %300, %304 : vector<1x8x16xf32>
    %c0_54 = arith.constant 0 : index
    %c0_55 = arith.constant 0 : index
    %c0_56 = arith.constant 0 : index
    %306 = vector.load %arg6[%c0_54, %c0_55, %c0_56] : memref<1x8x16xf32, #tpu.memory_space<vmem>>, vector<1x8x16xf32>
    tpu.vector_store %arg6[%c0_54, %c0_55, %c0_56], %305 {strides = array<i32>} : memref<1x8x16xf32, #tpu.memory_space<vmem>>, vector<1x8x16xf32>,
    return
  }
  func.func @transform_0(%arg0: i32, %arg1: i32) -> (i32, i32, i32, i32) {
    %c0_i32 = arith.constant 0 : i32
    %c0_i32_0 = arith.constant 0 : i32
    %c0_i32_1 = arith.constant 0 : i32
    return %arg0, %c0_i32, %arg1, %c0_i32_0 : i32, i32, i32, i32
  }
  func.func @transform_1(%arg0: i32, %arg1: i32) -> (i32, i32, i32, i32) {
    %c0_i32 = arith.constant 0 : i32
    %c0_i32_0 = arith.constant 0 : i32
    %c0_i32_1 = arith.constant 0 : i32
    return %arg0, %c0_i32, %arg1, %c0_i32_0 : i32, i32, i32, i32
  }
  func.func @transform_2(%arg0: i32, %arg1: i32) -> (i32, i32, i32, i32) {
    %c0_i32 = arith.constant 0 : i32
    %c0_i32_0 = arith.constant 0 : i32
    %c0_i32_1 = arith.constant 0 : i32
    return %arg0, %c0_i32, %arg1, %c0_i32_0 : i32, i32, i32, i32
  }
  func.func @transform_3(%arg0: i32, %arg1: i32) -> (i32, i32, i32) {
    %c0_i32 = arith.constant 0 : i32
    %c0_i32_0 = arith.constant 0 : i32
    %c0_i32_1 = arith.constant 0 : i32
    return %arg0, %c0_i32, %c0_i32_0 : i32, i32, i32
  }
  func.func @transform_4(%arg0: i32, %arg1: i32) -> (i32, i32, i32) {
    %c0_i32 = arith.constant 0 : i32
    %c0_i32_0 = arith.constant 0 : i32
    %c0_i32_1 = arith.constant 0 : i32
    return %arg0, %c0_i32, %c0_i32_0 : i32, i32, i32
  }
}

</mosaic_0001>

<bundles_post_ra>
// kernel: tpu_custom_call.1
= control target key start
LH: loop header
LB: loop body
LE: loop exit
PB: predicated region body
PF: predicated region fallthrough
CT: control target
= control target key end

     0   :  { %s1717_s0 = inlined_call_operand.hbm [shape: f32[2,3,16,16], index: 0, kind: input, shape index: {}]   ;;  %s1718_s1 = inlined_call_operand.hbm [shape: f32[2,1,16,16], index: 1, kind: input, shape index: {}]   ;;  %s1719_s2 = inlined_call_operand.hbm [shape: f32[2,1,16,16], index: 2, kind: input, shape index: {}]   ;;  %s1720_s3 = inlined_call_operand.hbm [shape: f32[2,8,16], index: 3, kind: output, shape index: {0}]   ;;  %s1721_s4 = inlined_call_operand.hbm [shape: f32[2,8,16], index: 4, kind: output, shape index: {1}]  }
   0x1   :  { %1731 = sst [smem:[#allocation18_spill]] %s1718_s1 }
   0x2   :  { %10 = vsyncpa [#allocation3], 0 }
   0x3   :  { %12 = vsyncpa [#allocation3 + $0x1], 0 }
   0x4   :  { %13 = vsyncpa [#allocation6], 0 }
   0x5   :  { %15 = vsyncpa [#allocation6 + $0x1], 0 }
   0x6   :  { %16 = vsyncpa [#allocation4], 0 }
   0x7   :  { %18 = vsyncpa [#allocation4 + $0x1], 0 }
   0x8   :  { %19 = vsyncpa [#allocation10], 0 }
   0x9   :  { %21 = vsyncpa [#allocation10 + $0x1], 0  ;;  %s1235_s15 = smov 0   ;;  %s1237_s16 = smov 0  }
   0xa   :  { %s1239_s17 = smov 0   ;;  %s1241_s18 = smov 0  }
   0xb   :  { %s1243_s19 = smov 0   ;;  %s1245_s20 = smov 0  }
   0xc LB: > { %s1266_s21 = sadd.s32 4294967295, %s1196_s20   ;;  %s878_s22 = sadd.s32 4294967294, %s1196_s20   ;;  %s1196_s20 = sphi %s1245_s20, %s27_s20   ;;  %s1192_s19 = sphi %s1243_s19, %s1758_s19   ;;  %s1188_s18 = sphi %s1241_s18, %s1757_s18   ;;  %s1184_s17 = sphi %s1239_s17, %s1756_s17   ;;  %s1180_s16 = sphi %s1237_s16, %s1755_s16   ;;  %s1176_s15 = sphi %s1235_s15, %s1754_s15  }
   0xd   : > { %s39_s23 = sadd.s32 1, %s1192_s19  ;;  %s48_s24 = sadd.s32 1, %s1184_s17 }
   0xe   : > { %p41_p0 = scmp.ge.s32.totalorder %s39_s23, 2  ;;  %p55_p1 = scmp.ne.s32.totalorder %s1184_s17, %s1180_s16 }
   0xf   : > { %p56_p2 = scmp.eq.s32.totalorder %s1196_s20, 0  ;;  %p61_p3 = scmp.ne.s32.totalorder %s1180_s16, %s1176_s15 }
  0x10   : > { %s1760_s23 = smov (%p41_p0, %s39_s23), 0  ;;  %p62_p5 = scmp.eq.s32.totalorder %s1266_s21, 0 }
  0x11   : > { %1732 = sst [smem:[#allocation15_spill]] %s1760_s23  ;;  %p1278_p4 = por %p56_p2, %p55_p1 }
  0x12   : > { %s43_s26 = ssub.s32 %s1192_s19, %s1760_s23  ;;  %p141_p6 = scmp.eq.s32.totalorder %s1266_s21, 1 }
  0x13   : > { %p46_p7 = scmp.eq.s32.totalorder %s43_s26, 0  ;;  %p1286_p8 = por %p62_p5, %p61_p3 }
  0x14   : > { %p1290_p9 = por %p141_p6, %p55_p1  ;;  %p147_p10 = scmp.eq.s32.totalorder %s878_s22, 1 }
  0x15   : > { %s1734_s27 = scalar_select %p1286_p8, 1, 0 }
  0x16   : > { %s1735_s28 = scalar_select %p1290_p9, 1, 0 }
  0x17   : > { %s1295_s29 = scalar_select %p46_p7, %s1184_s17, %s48_s24  }
  0x18   : > { %p1297_p11 = por %p147_p10, %p61_p3  ;;  %p931_p13 = scmp.lt.s32.totalorder %s1196_s20, 2 }
  0x19   : > { %1736 = sst [smem:[#allocation16_spill]] %s1295_s29  ;;  %s1722_s5 = sand.u32 1, %s1184_s17  }
  0x1a   : > { %s1737_s30 = scalar_select %p1297_p11, 1, 0 }
  0x1b   : > { %s1306_s6 = sshll.u32 %s1722_s5, 4  ;;  %p1310_p0 = pnand %p931_p13, %p1278_p4 }
  0x1c   : > { %1738 = sst [smem:[#allocation17_spill]] %s1737_s30  ;;  %s216_s8 = sand.u32 1, %s1196_s20  }
  0x1d   : > { %s901_s9 = sshll.u32 %s1192_s19, 8  ;;  %s220_s10 = scalar_lea.vmem [#allocation5], %s1306_s6 }
  0x1e   : > { %s229_s11 = sshll.u32 %s220_s10, 4  ;;  %s1740_s1 = sld [smem:[#allocation18_spill]]  ;;  %s1324_s11 = int_to_ptr.vmem [resolvable:$true] %s229_s11 }
  0x1f   : > { %s1326_s22 = scalar_lea.sflag [#allocation6], %s216_s8  ;;  %p1332_p2 = pneg %p1310_p0 }
  0x24   : > { %s1322_s14 = scalar_lea.hbm %s1740_s1, %s901_s9  ;;  %s993_s12 = scalar_lea.hbm %s1740_s1, 512 }
  0x25   : > { %s988_s24 = scalar_lea.hbm %s1322_s14, 256  ;;  %p994_p5 = scmp.lt.u32.totalorder %s1322_s14, %s1740_s1 }
  0x26   : > { %p989_p1 = scmp.ne.s32.totalorder %s1322_s14, %s988_s24  ;;  %p995_p6 = scmp.lt.u32.totalorder %s993_s12, %s988_s24 }
  0x27   : > { %p997_p10 = scmp.lt.u32.totalorder %s988_s24, %s1322_s14 }
  0x28   : > { %p991_p3 = pnand %p1332_p2, %p989_p1  ;;  %p996_p7 = por %p995_p6, %p994_p5 }
  0x2a   : > { %p992_p4 = pneg %p991_p3  ;;  %p998_p13 = por %p997_p10, %p996_p7 }
  0x2c   : > { %p999_p12 = pnand %p998_p13, %p992_p4 }
  0x2e   : > { %1002 = shalt.err (!%p999_p12)
}
  0x2f   : > { %s1003_s8 = scalar_lea.vmem %s1324_s11, 256  ;;  %s1198_s26 = smov [#allocation5]  }
  0x30   : > { %p1004_p1 = scmp.ne.s32.totalorder %s1324_s11, %s1003_s8  ;;  %s1008_s10 = sshll.u32 %s1198_s26, 4  ;;  %s1009_s10 = int_to_ptr.vmem [resolvable:$false] %s1008_s10 }
  0x31   : > { %s1010_s5 = scalar_lea.vmem %s1009_s10, 512  ;;  %p1011_p9 = scmp.lt.s32.totalorder %s1324_s11, %s1009_s10 }
  0x32   : > { %p1006_p3 = pnand %p1004_p1, %p1332_p2  ;;  %p1012_p8 = scmp.lt.s32.totalorder %s1010_s5, %s1003_s8 }
  0x34   : > { %p1007_p11 = pneg %p1006_p3  ;;  %p1013_p5 = por %p1012_p8, %p1011_p9 }
  0x36   : > { %p1014_p6 = pnand %p1013_p5, %p1007_p11 }
  0x38   : > { %1017 = shalt.err (!%p1014_p6)
}
  0x39   : > { %s1727_s24 = smov 128   ;;  %s1729_s12 = smov 8  }
  0x3a   : > { %920 = dma.hbm_to_vmem [thread:$0]  (!%p1310_p0), %s1322_s14, 256, %s1324_s11, %s1326_s22, %s1727_s24, %s1727_s24, %s1729_s12  }
  0x3b   : > { %s1364_s26 = scalar_lea.hbm %s1719_s2, %s901_s9  ;;  %p889_p8 = scmp.ge.s32.totalorder %s1196_s20, 1 }
  0x3c   : > { %p260_p9 = scmp.lt.s32.totalorder %s1196_s20, 3  ;;  %s903_s5 = smul.u32 768, %s1192_s19 }
  0x3d   : > { %s197_s1 = scalar_lea.vmem [#allocation2], %s1306_s6  ;;  %s243_s9 = scalar_lea.vmem [#allocation7], %s1306_s6 }
  0x3e   : > { %p1368_p11 = pnand %p889_p8, %p260_p9  ;;  %s206_s23 = sshll.u32 %s197_s1, 4  ;;  %s1374_s23 = int_to_ptr.vmem [resolvable:$true] %s206_s23 }
  0x3f   : > { %s1379_s11 = scalar_lea.hbm %s1717_s0, %s903_s5  ;;  %s1382_s14 = sshll.u32 %s243_s9, 4  ;;  %s1414_s14 = int_to_ptr.vmem [resolvable:$true] %s1382_s14 }
  0x40   : > { %s1742_s10 = scalar_select %p1368_p11, 1, 0 }
  0x41   : > { %s1743_s13 = sand.u32 1, %s1184_s17   ;;  %s1018_s24 = scalar_lea.hbm %s1379_s11, 256 }
  0x42   : > { %s1386_s8 = scalar_lea.sflag [#allocation3], %s1743_s13  ;;  %p1019_p12 = scmp.ne.s32.totalorder %s1379_s11, %s1018_s24 }
  0x43   : > { %s1023_s29 = scalar_lea.hbm %s1717_s0, 1536  ;;  %p1024_p10 = scmp.lt.u32.totalorder %s1379_s11, %s1717_s0 }
  0x44   : > { %p1021_p4 = pnand %p1019_p12, %p1332_p2  ;;  %p1025_p13 = scmp.lt.u32.totalorder %s1023_s29, %s1018_s24 }
  0x45   : > { %p1027_p3 = scmp.lt.u32.totalorder %s1018_s24, %s1379_s11 }
  0x46   : > { %p1022_p7 = pneg %p1021_p4  ;;  %p1026_p1 = por %p1025_p13, %p1024_p10 }
  0x48   : > { %p1028_p5 = por %p1027_p3, %p1026_p1 }
  0x4a   : > { %p1029_p6 = pnand %p1028_p5, %p1022_p7 }
  0x4c   : > { %1032 = shalt.err (!%p1029_p6)
}
  0x4d   : > { %s1033_s6 = scalar_lea.vmem %s1374_s23, 256  ;;  %s1201_s12 = smov [#allocation2]  }
  0x4e   : > { %p1034_p8 = scmp.ne.s32.totalorder %s1374_s23, %s1033_s6  ;;  %s1038_s9 = sshll.u32 %s1201_s12, 4  ;;  %s1039_s9 = int_to_ptr.vmem [resolvable:$false] %s1038_s9 }
  0x4f   : > { %s1040_s13 = scalar_lea.vmem %s1039_s9, 512  ;;  %p1041_p4 = scmp.lt.s32.totalorder %s1374_s23, %s1039_s9 }
  0x50   : > { %p1036_p9 = pnand %p1034_p8, %p1332_p2  ;;  %p1042_p11 = scmp.lt.s32.totalorder %s1040_s13, %s1033_s6 }
  0x52   : > { %p1037_p12 = pneg %p1036_p9  ;;  %p1043_p10 = por %p1042_p11, %p1041_p4 }
  0x54   : > { %p1044_p13 = pnand %p1043_p10, %p1037_p12 }
  0x56   : > { %1047 = shalt.err (!%p1044_p13)
}
  0x57   : > { %s1744_s24 = smov 8   ;;  %s1745_s1 = smov 128  }
  0x58   : > { %917 = dma.hbm_to_vmem [thread:$0]  (!%p1310_p0), %s1379_s11, 256, %s1374_s23, %s1386_s8, %s1745_s1, %s1745_s1, %s1744_s24  }
  0x59   : > { %s1048_s29 = scalar_lea.hbm %s1364_s26, 256  ;;  %s1053_s6 = scalar_lea.hbm %s1719_s2, 512 }
  0x5a   : > { %p1049_p11 = scmp.ne.s32.totalorder %s1364_s26, %s1048_s29  ;;  %p1054_p3 = scmp.lt.u32.totalorder %s1364_s26, %s1719_s2 }
  0x5b   : > { %p1055_p5 = scmp.lt.u32.totalorder %s1053_s6, %s1048_s29  ;;  %p1057_p8 = scmp.lt.u32.totalorder %s1048_s29, %s1364_s26 }
  0x5c   : > { %p1051_p7 = pnand %p1049_p11, %p1332_p2 }
  0x5d   : > { %p1056_p6 = por %p1055_p5, %p1054_p3 }
  0x5e   : > { %p1052_p1 = pneg %p1051_p7 }
  0x5f   : > { %p1058_p9 = por %p1057_p8, %p1056_p6 }
  0x61   : > { %p1059_p12 = pnand %p1058_p9, %p1052_p1 }
  0x63   : > { %1062 = shalt.err (!%p1059_p12)
}
  0x64   : > { %s1063_s23 = scalar_lea.vmem %s1414_s14, 256  ;;  %s1202_s11 = smov [#allocation7]  }
  0x65   : > { %p1064_p4 = scmp.ne.s32.totalorder %s1414_s14, %s1063_s23  ;;  %s1068_s8 = sshll.u32 %s1202_s11, 4  ;;  %s1069_s8 = int_to_ptr.vmem [resolvable:$false] %s1068_s8 }
  0x66   : > { %s1070_s13 = scalar_lea.vmem %s1069_s8, 512  ;;  %p1071_p11 = scmp.lt.s32.totalorder %s1414_s14, %s1069_s8 }
  0x67   : > { %p1066_p10 = pnand %p1064_p4, %p1332_p2  ;;  %p1072_p7 = scmp.lt.s32.totalorder %s1070_s13, %s1063_s23 }
  0x69   : > { %p1067_p13 = pneg %p1066_p10  ;;  %p1073_p3 = por %p1072_p7, %p1071_p11 }
  0x6b   : > { %p1074_p5 = pnand %p1073_p3, %p1067_p13 }
  0x6d   : > { %1077 = shalt.err (!%p1074_p5)
}
  0x6e   : > { %923 = dma.hbm_to_vmem [thread:$0]  (!%p1310_p0), %s1364_s26, 256, %s1414_s14, %s1326_s22, %s1745_s1, %s1745_s1, %s1744_s24  }
  0x6f   : > { %p1746_p2 = scmp.ne.s32.totalorder %s1742_s10, 0 }
  0x70   : > { %s1444_s25 = sand.u32 (!%p1746_p2), 1, %s1180_s16   ;;  %p1747_p1 = scmp.ne.s32.totalorder (!%p1746_p2), %s1734_s27, 0 }
  0x71   : > { %264 = sbr.rel (%p1746_p2) target bundleno = 323 (0x143), region = 32  ;;  %s1447_s29 = sshll.u32 (!%p1746_p2), %s1444_s25, 4 }
  0x72   : > { %s267_s7 = scalar_lea.sflag (!%p1746_p2), [#allocation3], %s1444_s25  ;;  %s270_s30 = scalar_lea.vmem (!%p1746_p2), [#allocation2], %s1447_s29 }
  0x78   : > { %1159 = dma.done.wait (%p1747_p1), %s267_s7, 256  }
  0x79   : > { %1161 = vsyncadd (%p1747_p1), %s267_s7, 4294967040  ;;  %s275_s22 = sand.u32 1, %s1266_s21   ;;  %s279_s10 = scalar_lea.vmem [#allocation5], %s1447_s29 }
  0x7a   : > { %s276_s26 = scalar_lea.sflag [#allocation6], %s275_s22 }
  0x7b   : > { %1163 = dma.done.wait (%p1747_p1), %s276_s26, 512  }
  0x7c   : > { %1165 = vsyncadd (%p1747_p1), %s276_s26, 4294966784  ;;  %v1461_v0 = vld [vmem:[%s270_s30] sm:$0xff]  ;;  %s1203_s14 = smov 15   ;;  %s1204_s24 = smov 127   ;;  %v1465_v1 = vld [vmem:[%s270_s30 + $0x8] sm:$0xff]  ;;  %vm671_vm0 = vcmask 130048  }
  0x7d   : > { %356 = vrot.lane.b32.xlu1 %v1461_v0, %s1203_s14  ;;  %350 = vrot.lane.b32.xlu0 %v1461_v0, %s1204_s24  ;;  %s1205_s21 = smov 113   ;;  %s1206_s27 = smov 1   ;;  %v1473_v2 = vld [vmem:[%s279_s10 + $0x8] sm:$0xff]  ;;  %v1475_v3 = vld [vmem:[%s279_s10] sm:$0xff]  ;;  %v1207_v12 = vmov 0.0  }
  0x7e   : > { %s288_s1 = scalar_lea.vmem [#allocation7], %s1447_s29  ;;  %v656_v6 = vmax.f32 %v1465_v1, %v1473_v2  ;;  %v655_v7 = vmax.f32 %v1461_v0, %v1475_v3  ;;  %s893_s5 = sshll.u32 %s1444_s25, 3 }
  0x7f   : > { %v1486_v4 = vld [vmem:[%s288_s1 + $0x8] sm:$0xff]  ;;  %v1488_v5 = vld [vmem:[%s288_s1] sm:$0xff]  ;;  %s320_s6 = scalar_lea.vmem [#allocation8], %s893_s5  ;;  %s1506_s12 = scalar_lea.vmem [#allocation9], %s893_s5 }
  0x80   : > { %v658_v8 = vsub.f32 %v656_v6, %v1486_v4  ;;  %v657_v9 = vsub.f32 %v655_v7, %v1488_v5  ;;  %672 = vst.msk [vmem:[%s320_s6] sm:$0xff] %vm671_vm0, %v1207_v12  ;;  %673 = vst.msk [vmem:[%s1506_s12] sm:$0xff] %vm671_vm0, %v1207_v12  ;;  %s897_s9 = sshll.u32 %s1188_s18, 7  ;;  %s702_s23 = sshll.u32 %s320_s6, 4  ;;  %s1518_s23 = int_to_ptr.vmem [resolvable:$true] %s702_s23 }
  0x81   : > { %358 = vrot.lane.b32.xlu1 %v1465_v1, %s1203_s14  ;;  %352 = vrot.lane.b32.xlu0 %v1465_v1, %s1204_s24  ;;  %s1516_s13 = scalar_lea.hbm %s1720_s3, %s897_s9  ;;  %s684_s29 = scalar_lea.sflag [#allocation4], %s1444_s25 }
  0x82   : > { %v660_v10 = vand.u32 2147483647, %v658_v8  ;;  %v659_v11 = vand.u32 2147483647, %v657_v9  ;;  %s1078_s7 = scalar_lea.vmem %s1518_s23, 128  ;;  %p1748_p6 = scmp.ne.s32.totalorder %s1735_s28, 0 }
  0x83   : > { %p1079_p0 = scmp.ne.s32.totalorder %s1518_s23, %s1078_s7  ;;  %s1208_s30 = smov [#allocation8]  }
  0x84   : > { %v675_v13 = vadd.f32 %v660_v10, %v659_v11  ;;  %s1082_s22 = sshll.u32 %s1208_s30, 4  ;;  %s1083_s22 = int_to_ptr.vmem [resolvable:$false] %s1082_s22 }
  0x85   : > { %371 = vrot.lane.b32.xlu1 %v1465_v1, %s1205_s21  ;;  %369 = vrot.lane.b32.xlu0 %v1461_v0, %s1205_s21  ;;  %p1080_p8 = pnand %p1079_p0, %p1748_p6  ;;  %s1084_s26 = scalar_lea.vmem %s1083_s22, 256 }
  0x86   : > { %p1085_p12 = scmp.lt.s32.totalorder %s1518_s23, %s1083_s22  ;;  %p1086_p4 = scmp.lt.s32.totalorder %s1084_s26, %s1078_s7 }
  0x87   : > { %v674_v14 = vld [vmem:[%s320_s6] sm:$0xff]  ;;  %p1081_p9 = pneg %p1080_p8 }
  0x88   : > { %v676_v15 = vadd.f32 %v675_v13, %v674_v14  ;;  %p1087_p10 = por %p1086_p4, %p1085_p12 }
  0x89   : > { %377 = vrot.lane.b32.xlu1 %v1465_v1, %s1206_s27  ;;  %375 = vrot.lane.b32.xlu0 %v1461_v0, %s1206_s27 }
  0x8a   : > { %678 = vst.msk [vmem:[%s320_s6] sm:$0xff] %vm671_vm0, %v676_v15  ;;  %p1088_p13 = pnand %p1087_p10, %p1081_p9 }
  0x8d   : > { %467 = vrot.lane.b32.xlu1 %v1473_v2, %s1204_s24  ;;  %465 = vrot.lane.b32.xlu0 %v1475_v3, %s1204_s24 }
  0x91   : > { %473 = vrot.lane.b32.xlu1 %v1473_v2, %s1203_s14  ;;  %471 = vrot.lane.b32.xlu0 %v1475_v3, %s1203_s14 }
  0x95   : > { %483 = vrot.lane.b32.xlu1 %v1473_v2, %s1205_s21  ;;  %481 = vrot.lane.b32.xlu0 %v1475_v3, %s1205_s21 }
  0x99   : > { %489 = vrot.lane.b32.xlu1 %v1473_v2, %s1206_s27  ;;  %487 = vrot.lane.b32.xlu0 %v1475_v3, %s1206_s27 }
  0x9d   : > { %563 = vrot.lane.b32.xlu1 %v1486_v4, %s1204_s24  ;;  %561 = vrot.lane.b32.xlu0 %v1488_v5, %s1204_s24 }
  0xa1   : > { %569 = vrot.lane.b32.xlu1 %v1486_v4, %s1203_s14  ;;  %567 = vrot.lane.b32.xlu0 %v1488_v5, %s1203_s14 }
  0xa5   : > { %579 = vrot.lane.b32.xlu1 %v1486_v4, %s1205_s21  ;;  %577 = vrot.lane.b32.xlu0 %v1488_v5, %s1205_s21 }
  0xa9   : > { %585 = vrot.lane.b32.xlu1 %v1486_v4, %s1206_s27  ;;  %583 = vrot.lane.b32.xlu0 %v1488_v5, %s1206_s27 }
  0xaa   : > { %1091 = shalt.err (!%p1088_p13)
}
  0xab   : > { %s1092_s10 = scalar_lea.hbm %s1516_s13, 128  ;;  %s1096_s21 = scalar_lea.hbm %s1720_s3, 256 }
  0xac   : > { %p1093_p11 = scmp.ne.s32.totalorder %s1516_s13, %s1092_s10  ;;  %p1097_p5 = scmp.lt.u32.totalorder %s1516_s13, %s1720_s3 }
  0xad   : > { %p1098_p2 = scmp.lt.u32.totalorder %s1096_s21, %s1092_s10  ;;  %p1100_p0 = scmp.lt.u32.totalorder %s1092_s10, %s1516_s13 }
  0xae   : > { %p1094_p7 = pnand %p1093_p11, %p1748_p6 }
  0xaf   : > { %p1099_p1 = por %p1098_p2, %p1097_p5 }
  0xb0   : > { %p1095_p3 = pneg %p1094_p7 }
  0xb1   : > { %p1101_p8 = por %p1100_p0, %p1099_p1 }
  0xb3   : > { %p1102_p9 = pnand %p1101_p8, %p1095_p3 }
  0xb5   : > { %1105 = shalt.err (!%p1102_p9)
}
  0xb6   : > { %910 = dma.vmem_to_hbm [thread:$0]  (%p1748_p6), %s1518_s23, 128, %s1516_s13, %s684_s29   ;;  %v331_v16 = vlaneseq  ;;  %vm362_vm1 = vcmask 121856   ;;  %v390_v26 = vmul.f32 2.0, %v1461_v0  ;;  %v391_v27 = vmul.f32 2.0, %v1465_v1 }
  0xb7   : > { %vm381_vm3 = vcmask 7168   ;;  %vm400_vm5 = vcmask 1040384   ;;  %vm419_vm7 = vcmask 1046528   ;;  %v500_v13 = vmul.f32 2.0, %v1473_v2  ;;  %s715_s5 = sshll.u32 %s1506_s12, 4  ;;  %s1666_s11 = scalar_lea.hbm %s1721_s4, %s897_s9  ;;  %s1668_s5 = int_to_ptr.vmem [resolvable:$true] %s715_s5 }
  0xb8   : > { %v1543_v19 = vand.u32 127, %v331_v16  ;;  %v1555_v30 = vshrl.u32 %v331_v16, 7  ;;  %v499_v14 = vmul.f32 2.0, %v1475_v3  ;;  %s689_s8 = scalar_lea.sflag [#allocation10], %s1444_s25  ;;  %s1106_s13 = scalar_lea.vmem %s1668_s5, 128 }
  0xb9   : > { %p1107_p12 = scmp.ne.s32.totalorder %s1668_s5, %s1106_s13  ;;  %s1209_s29 = smov [#allocation9]  }
  0xba   : > { %vm336_vm2 = vcmp.lt.s32.totalorder %v1543_v19, 15  ;;  %vm337_vm4 = vcmp.gt.s32.totalorder %v1543_v19, 0  ;;  %v1564_v43 = vadd.s32 8, %v1555_v30  ;;  %vm338_vm6 = vcmp.eq.s32.totalorder %v1555_v30, 0  ;;  %s1110_s18 = sshll.u32 %s1209_s29, 4  ;;  %s1111_s18 = int_to_ptr.vmem [resolvable:$false] %s1110_s18 }
  0xbb   : > { %p1108_p4 = pnand %p1107_p12, %p1748_p6  ;;  %s1112_s7 = scalar_lea.vmem %s1111_s18, 256 }
  0xbc   : > { %vm341_vm8 = vcmp.eq.s32.totalorder %v1564_v43, 15  ;;  %v679_v43 = vld [vmem:[%s1506_s12] sm:$0xff]  ;;  %p1113_p13 = scmp.lt.s32.totalorder %s1668_s5, %s1111_s18  ;;  %p1114_p11 = scmp.lt.s32.totalorder %s1112_s7, %s1106_s13 }
  0xbd   : > { %p1109_p10 = pneg %p1108_p4 }
  0xbe   : > { %p1115_p7 = por %p1114_p11, %p1113_p13 }
  0xc0   : > { %p1116_p3 = pnand %p1115_p7, %p1109_p10 }
  0xef   : > { %v357_v17 = vpop.permute.xlu1 %356  ;;  %v351_v18 = vpop.permute.xlu0 %350 }
  0xf0   : > { %v363_v22 = vsel %vm362_vm1, %v351_v18, %v357_v17 }
  0xf1   : > { %v367_v28 = vsel %vm336_vm2, %v363_v22, 0.0 }
  0xf2   : > { %v392_v33 = vadd.f32 %v390_v26, %v367_v28 }
  0xf3   : > { %v359_v20 = vpop.permute.xlu1 %358  ;;  %v353_v21 = vpop.permute.xlu0 %352 }
  0xf4   : > { %v364_v23 = vsel %vm362_vm1, %v353_v21, %v359_v20 }
  0xf5   : > { %v368_v29 = vsel %vm336_vm2, %v364_v23, 0.0 }
  0xf6   : > { %v393_v34 = vadd.f32 %v391_v27, %v368_v29 }
  0xf7   : > { %v372_v24 = vpop.permute.xlu1 %371  ;;  %v370_v25 = vpop.permute.xlu0 %369 }
  0xfb   : > { %v378_v31 = vpop.permute.xlu1 %377  ;;  %v376_v32 = vpop.permute.xlu0 %375 }
  0xfc   : > { %v383_v35 = vsel %vm381_vm3, %v372_v24, %v378_v31  ;;  %v382_v36 = vsel %vm381_vm3, %v370_v25, %v376_v32 }
  0xfd   : > { %v387_v37 = vsel %vm337_vm4, %v383_v35, 0.0  ;;  %v386_v38 = vsel %vm337_vm4, %v382_v36, 0.0 }
  0xfe   : > { %v389_v39 = vsub.f32 %v368_v29, %v387_v37  ;;  %v395_v40 = vadd.f32 %v393_v34, %v387_v37  ;;  %v388_v41 = vsub.f32 %v367_v28, %v386_v38  ;;  %v394_v42 = vadd.f32 %v392_v33, %v386_v38 }
  0xff   : > { %v468_v44 = vpop.permute.xlu1 %467  ;;  %v466_v45 = vpop.permute.xlu0 %465  ;;  %v596_v38 = vmul.f32 2.0, %v1486_v4 }
 0x100   : > { %v397_v46 = vrot.slane %v389_v39, 7  ;;  %v436_v47 = vrot.slane %v395_v40, 7  ;;  %v447_v48 = vrot.slane %v395_v40, 1  ;;  %v401_v49 = vrot.slane %v388_v41, 7 }
 0x101   : > { %v439_v50 = vrot.slane %v394_v42, 7  ;;  %v446_v51 = vrot.slane %v394_v42, 1  ;;  %v421_v52 = vrot.slane %v389_v39, 1  ;;  %v420_v54 = vrot.slane %v388_v41, 1 }
 0x102   : > { %v405_v53 = vsel %vm400_vm5, %v397_v46, %v401_v49  ;;  %v416_v57 = vmul.f32 2.0, %v389_v39  ;;  %v402_v59 = vsel %vm400_vm5, %v401_v49, %v397_v46  ;;  %v415_v7 = vmul.f32 2.0, %v388_v41 }
 0x103   : > { %v474_v55 = vpop.permute.xlu1 %473  ;;  %v472_v56 = vpop.permute.xlu0 %471  ;;  %v1570_v58 = vsel %vm400_vm5, %v439_v50, %v436_v47  ;;  %v443_v60 = vsel %vm400_vm5, %v436_v47, %v439_v50  ;;  %v1575_v61 = vsel %vm419_vm7, %v446_v51, %v447_v48  ;;  %v452_v62 = vsel %vm419_vm7, %v447_v48, %v446_v51 }
 0x104   : > { %v413_v63 = vsel %vm338_vm6, 0.0, %v405_v53  ;;  %v1582_v0 = vsel %vm338_vm6, 0.0, %v443_v60  ;;  %v1586_v1 = vsel %vm341_vm8, 0.0, %v452_v62  ;;  %v478_v6 = vsel %vm362_vm1, %v468_v44, %v474_v55 }
 0x105   : > { %v426_v8 = vsel %vm419_vm7, %v421_v52, %v420_v54  ;;  %v455_v9 = vsub.f32 %v1582_v0, %v1575_v61  ;;  %v456_v10 = vsub.f32 %v1570_v58, %v1586_v1  ;;  %v477_v15 = vsel %vm362_vm1, %v466_v45, %v472_v56 }
 0x106   : > { %v417_v16 = vadd.f32 %v415_v7, %v413_v63  ;;  %v418_v17 = vadd.f32 %v416_v57, %v402_v59  ;;  %v480_v18 = vsel %vm336_vm2, %v478_v6, 0.0  ;;  %v432_v20 = vsel %vm341_vm8, 0.0, %v426_v8 }
 0x107   : > { %v484_v11 = vpop.permute.xlu1 %483  ;;  %v482_v12 = vpop.permute.xlu0 %481  ;;  %v479_v21 = vsel %vm336_vm2, %v477_v15, 0.0  ;;  %v422_v22 = vsel %vm419_vm7, %v420_v54, %v421_v52  ;;  %v502_v2 = vadd.f32 %v500_v13, %v480_v18  ;;  %v595_v39 = vmul.f32 2.0, %v1488_v5 }
 0x108   : > { %v501_v25 = vadd.f32 %v499_v14, %v479_v21  ;;  %v433_v27 = vadd.f32 %v422_v22, %v417_v16  ;;  %v434_v28 = vadd.f32 %v432_v20, %v418_v17  ;;  %v460_v13 = vand.u32 2147483647, %v456_v10 }
 0x109   : > { %v459_v20 = vand.u32 2147483647, %v455_v9 }
 0x10a   : > { %v458_v45 = vand.u32 2147483647, %v434_v28  ;;  %v457_v49 = vand.u32 2147483647, %v433_v27 }
 0x10b   : > { %v490_v23 = vpop.permute.xlu1 %489  ;;  %v488_v24 = vpop.permute.xlu0 %487 }
 0x10c   : > { %v494_v3 = vsel %vm381_vm3, %v484_v11, %v490_v23  ;;  %v493_v26 = vsel %vm381_vm3, %v482_v12, %v488_v24 }
 0x10d   : > { %v496_v29 = vsel %vm337_vm4, %v494_v3, 0.0  ;;  %v495_v31 = vsel %vm337_vm4, %v493_v26, 0.0  ;;  %v461_v3 = vadd.f32 %v459_v20, %v457_v49  ;;  %v462_v26 = vadd.f32 %v460_v13, %v458_v45 }
 0x10e   : > { %v498_v32 = vsub.f32 %v480_v18, %v496_v29  ;;  %v504_v33 = vadd.f32 %v502_v2, %v496_v29  ;;  %v497_v34 = vsub.f32 %v479_v21, %v495_v31  ;;  %v503_v35 = vadd.f32 %v501_v25, %v495_v31 }
 0x10f   : > { %v564_v36 = vpop.permute.xlu1 %563  ;;  %v562_v37 = vpop.permute.xlu0 %561 }
 0x110   : > { %v506_v40 = vrot.slane %v498_v32, 7  ;;  %v517_v41 = vmul.f32 2.0, %v498_v32  ;;  %v521_v42 = vrot.slane %v498_v32, 1  ;;  %v532_v44 = vrot.slane %v504_v33, 7 }
 0x111   : > { %v543_v46 = vrot.slane %v504_v33, 1  ;;  %v509_v47 = vrot.slane %v497_v34, 7  ;;  %v520_v48 = vrot.slane %v497_v34, 1  ;;  %v516_v50 = vmul.f32 2.0, %v497_v34 }
 0x112   : > { %v535_v51 = vrot.slane %v503_v35, 7  ;;  %v542_v52 = vrot.slane %v503_v35, 1 }
 0x113   : > { %v510_v53 = vsel %vm400_vm5, %v509_v47, %v506_v40  ;;  %v513_v54 = vsel %vm400_vm5, %v506_v40, %v509_v47  ;;  %v522_v4 = vsel %vm419_vm7, %v520_v48, %v521_v42  ;;  %v526_v5 = vsel %vm419_vm7, %v521_v42, %v520_v48  ;;  %v570_v55 = vpop.permute.xlu1 %569  ;;  %v568_v56 = vpop.permute.xlu0 %567 }
 0x114   : > { %v514_v57 = vsel %vm338_vm6, 0.0, %v513_v54  ;;  %v519_v58 = vadd.f32 %v517_v41, %v510_v53  ;;  %v528_v59 = vsel %vm341_vm8, 0.0, %v526_v5  ;;  %v536_v60 = vsel %vm400_vm5, %v535_v51, %v532_v44 }
 0x115   : > { %v518_v62 = vadd.f32 %v516_v50, %v514_v57  ;;  %v539_v63 = vsel %vm400_vm5, %v532_v44, %v535_v51  ;;  %v544_v1 = vsel %vm419_vm7, %v542_v52, %v543_v46  ;;  %v548_v6 = vsel %vm419_vm7, %v543_v46, %v542_v52 }
 0x116   : > { %v530_v7 = vadd.f32 %v528_v59, %v519_v58  ;;  %v540_v8 = vsel %vm338_vm6, 0.0, %v539_v63  ;;  %v550_v11 = vsel %vm341_vm8, 0.0, %v548_v6  ;;  %v574_v12 = vsel %vm362_vm1, %v564_v36, %v570_v55 }
 0x117   : > { %v529_v14 = vadd.f32 %v522_v4, %v518_v62  ;;  %v551_v15 = vsub.f32 %v540_v8, %v544_v1  ;;  %v552_v16 = vsub.f32 %v536_v60, %v550_v11  ;;  %v580_v17 = vpop.permute.xlu1 %579  ;;  %v578_v18 = vpop.permute.xlu0 %577  ;;  %v576_v22 = vsel %vm336_vm2, %v574_v12, 0.0 }
 0x118   : > { %v554_v21 = vand.u32 2147483647, %v530_v7  ;;  %v573_v23 = vsel %vm362_vm1, %v562_v37, %v568_v56  ;;  %v598_v61 = vadd.f32 %v596_v38, %v576_v22 }
 0x119   : > { %v553_v24 = vand.u32 2147483647, %v529_v14  ;;  %v555_v2 = vand.u32 2147483647, %v551_v15  ;;  %v556_v25 = vand.u32 2147483647, %v552_v16 }
 0x11a   : > { %v575_v10 = vsel %vm336_vm2, %v573_v23, 0.0 }
 0x11b   : > { %v557_v27 = vadd.f32 %v555_v2, %v553_v24  ;;  %v558_v28 = vadd.f32 %v556_v25, %v554_v21  ;;  %v586_v29 = vpop.permute.xlu1 %585  ;;  %v584_v31 = vpop.permute.xlu0 %583  ;;  %v597_v0 = vadd.f32 %v595_v39, %v575_v10 }
 0x11c   : > { %v590_v9 = vsel %vm381_vm3, %v580_v17, %v586_v29  ;;  %v589_v32 = vsel %vm381_vm3, %v578_v18, %v584_v31 }
 0x11d   : > { %v661_v33 = vmax.f32 %v461_v3, %v557_v27  ;;  %v662_v34 = vmax.f32 %v462_v26, %v558_v28  ;;  %v592_v35 = vsel %vm337_vm4, %v590_v9, 0.0  ;;  %v591_v36 = vsel %vm337_vm4, %v589_v32, 0.0 }
 0x11e   : > { %v594_v37 = vsub.f32 %v576_v22, %v592_v35  ;;  %v600_v40 = vadd.f32 %v598_v61, %v592_v35  ;;  %v593_v41 = vsub.f32 %v575_v10, %v591_v36  ;;  %v599_v42 = vadd.f32 %v597_v0, %v591_v36 }
 0x120   : > { %v602_v44 = vrot.slane %v594_v37, 7  ;;  %v613_v45 = vmul.f32 2.0, %v594_v37  ;;  %v617_v38 = vrot.slane %v594_v37, 1  ;;  %v628_v39 = vrot.slane %v600_v40, 7 }
 0x121   : > { %v639_v46 = vrot.slane %v600_v40, 1  ;;  %v605_v47 = vrot.slane %v593_v41, 7  ;;  %v616_v48 = vrot.slane %v593_v41, 1  ;;  %v631_v49 = vrot.slane %v599_v42, 7 }
 0x122   : > { %v638_v50 = vrot.slane %v599_v42, 1  ;;  %v612_v53 = vmul.f32 2.0, %v593_v41 }
 0x123   : > { %v606_v51 = vsel %vm400_vm5, %v605_v47, %v602_v44  ;;  %v609_v52 = vsel %vm400_vm5, %v602_v44, %v605_v47  ;;  %v622_v19 = vsel %vm419_vm7, %v617_v38, %v616_v48  ;;  %v632_v55 = vsel %vm400_vm5, %v631_v49, %v628_v39 }
 0x124   : > { %v610_v54 = vsel %vm338_vm6, 0.0, %v609_v52  ;;  %v615_v4 = vadd.f32 %v613_v45, %v606_v51  ;;  %v624_v5 = vsel %vm341_vm8, 0.0, %v622_v19  ;;  %v635_v57 = vsel %vm400_vm5, %v628_v39, %v631_v49 }
 0x125   : > { %v614_v56 = vadd.f32 %v612_v53, %v610_v54  ;;  %v640_v58 = vsel %vm419_vm7, %v638_v50, %v639_v46  ;;  %v644_v59 = vsel %vm419_vm7, %v639_v46, %v638_v50  ;;  %v618_v60 = vsel %vm419_vm7, %v616_v48, %v617_v38 }
 0x126   : > { %v626_v62 = vadd.f32 %v624_v5, %v615_v4  ;;  %v636_v63 = vsel %vm338_vm6, 0.0, %v635_v57  ;;  %v646_v1 = vsel %vm341_vm8, 0.0, %v644_v59 }
 0x127   : > { %v625_v6 = vadd.f32 %v618_v60, %v614_v56  ;;  %v647_v7 = vsub.f32 %v636_v63, %v640_v58  ;;  %v648_v8 = vsub.f32 %v632_v55, %v646_v1 }
 0x128   : > { %v650_v11 = vand.u32 2147483647, %v626_v62 }
 0x129   : > { %v649_v12 = vand.u32 2147483647, %v625_v6  ;;  %v651_v13 = vand.u32 2147483647, %v647_v7  ;;  %v652_v14 = vand.u32 2147483647, %v648_v8 }
 0x12b   : > { %v653_v15 = vadd.f32 %v651_v13, %v649_v12  ;;  %v654_v16 = vadd.f32 %v652_v14, %v650_v11 }
 0x12d   : > { %v663_v30 = vsub.f32 %v661_v33, %v653_v15  ;;  %v664_v17 = vsub.f32 %v662_v34, %v654_v16 }
 0x12f   : > { %v665_v18 = vand.u32 2147483647, %v663_v30  ;;  %v666_v20 = vand.u32 2147483647, %v664_v17 }
 0x131   : > { %v680_v21 = vadd.f32 %v666_v20, %v665_v18 }
 0x133   : > { %v681_v22 = vadd.f32 %v680_v21, %v679_v43 }
 0x135   : > { %682 = vst.msk [vmem:[%s1506_s12] sm:$0xff] %vm671_vm0, %v681_v22 }
 0x136   : > { %1119 = shalt.err (!%p1116_p3)
}
 0x137   : > { %s1120_s25 = scalar_lea.hbm %s1666_s11, 128  ;;  %s1124_s30 = scalar_lea.hbm %s1721_s4, 256 }
 0x138   : > { %p1121_p5 = scmp.ne.s32.totalorder %s1666_s11, %s1120_s25  ;;  %p1125_p0 = scmp.lt.u32.totalorder %s1666_s11, %s1721_s4 }
 0x139   : > { %p1126_p8 = scmp.lt.u32.totalorder %s1124_s30, %s1120_s25  ;;  %p1128_p12 = scmp.lt.u32.totalorder %s1120_s25, %s1666_s11 }
 0x13a   : > { %p1122_p2 = pnand %p1121_p5, %p1748_p6 }
 0x13b   : > { %p1127_p9 = por %p1126_p8, %p1125_p0 }
 0x13c   : > { %p1123_p1 = pneg %p1122_p2 }
 0x13d   : > { %p1129_p4 = por %p1128_p12, %p1127_p9 }
 0x13f   : > { %p1130_p10 = pnand %p1129_p4, %p1123_p1 }
 0x141   : > { %1133 = shalt.err (!%p1130_p10)
}
 0x142   : > { %911 = dma.vmem_to_hbm [thread:$0]  (%p1748_p6), %s1668_s5, 128, %s1666_s11, %s689_s8  }
 0x143 PF: > { %s1749_s10 = sld [smem:[#allocation17_spill]]  ;;  %s727_s14 = sand.u32 1, %s1176_s15  }
 0x144   : > { %p1751_p11 = scmp.ge.s32.totalorder %s1196_s20, 2  ;;  %s728_s24 = scalar_lea.sflag [#allocation4], %s727_s14 }
 0x149   : > { %p1750_p13 = scmp.ne.s32.totalorder %s1749_s10, 0 }
 0x14b   : > { %p925_p7 = pnand %p1751_p11, %p1750_p13 }
 0x14d   : > { %1167 = dma.done.wait (!%p925_p7), %s728_s24, 128  }
 0x14e   : > { %1169 = vsyncadd (!%p925_p7), %s728_s24, 4294967168  ;;  %s737_s21 = scalar_lea.sflag [#allocation10], %s727_s14 }
 0x14f   : > { %1171 = dma.done.wait (!%p925_p7), %s737_s21, 128  }
 0x150   : > { %1173 = vsyncadd (!%p925_p7), %s737_s21, 4294967168  ;;  %s27_s20 = sadd.s32 1, %s1196_s20   ;;  %s1752_s28 = sld [smem:[#allocation16_spill]] }
 0x151   : > { %p24_p3 = scmp.ge.s32.totalorder %s27_s20, 4   ;;  %s1753_s27 = sld [smem:[#allocation15_spill]] }
 0x152   : > { %s1754_s15 = smov %s1180_s16  ;;  %s1755_s16 = smov %s1184_s17 }
 0x153   : > { %s1757_s18 = smov %s1192_s19  ;;  %26 = sbr.rel (!%p24_p3) target bundleno = 12 (0xc), region = 122 }
 0x156   : > { %s1756_s17 = smov %s1752_s28 }
 0x157   : > { %s1758_s19 = smov %s1753_s27 }
 0x15a   :  { %742 = vsyncpa [#allocation3], 1 }
 0x15b   :  { %744 = vsyncpa [#allocation3 + $0x1], 1 }
 0x15c   :  { %745 = vsyncpa [#allocation6], 1 }
 0x15d   :  { %747 = vsyncpa [#allocation6 + $0x1], 1 }
 0x15e   :  { %748 = vsyncpa [#allocation4], 1 }
 0x15f   :  { %750 = vsyncpa [#allocation4 + $0x1], 1 }
 0x160   :  { %751 = vsyncpa [#allocation10], 1 }
 0x161   :  { %753 = vsyncpa [#allocation10 + $0x1], 1 }

</bundles_post_ra>
